<compile_context>
chip_gen: v7x
topology: tpu7x:2x2x1
jax: 0.10.0
libtpu: 0.0.40
codegen_flags: <defaults>
</compile_context>

<pallas_src>
from functools import partial

import jax
import jax.numpy as jnp
from jax.experimental import pallas as pl
from jax.experimental.pallas import tpu as pltpu


_BLOCK_BYTES = 4 * 1024 * 1024   # ~4 MiB per block (per direction)
_ROW_ALIGN = 32                  # sublane multiple safe for every dtype packing
_LANES = (512, 256, 128)         # lane-dense last dims (multiples of 128)


def _round_up(a, b):
    return ((a + b - 1) // b) * b


def _pick_lane(total):
    for lane in _LANES:
        if total % lane == 0:
            return lane
    return None


def _active_ben_kernel(x_ref, o_ref):
    # x_ref / o_ref: [tile_rows, lane] tile in VMEM.
    x = x_ref[...]
    # Clamp identity (equivalent to the 3-branch piecewise definition):
    #   t = clip(x, -1, 1);  out = x - t + t*(t*t + 3)/6
    t = jnp.clip(x, -1.0, 1.0)
    o_ref[...] = x - t + t * (t * t + 3.0) * (1.0 / 6.0)


def _run_2d(x2d, *, in_place):
    rows, lane = x2d.shape
    itemsize = jnp.dtype(x2d.dtype).itemsize

    if rows <= 2 * _ROW_ALIGN:
        # Tiny input: one full-extent block (full array dims are always a
        # legal block shape regardless of (8,128)/packing divisibility).
        tile_rows = rows
    else:
        max_rows = max(_ROW_ALIGN, _BLOCK_BYTES // (lane * itemsize))
        # >= 2 grid steps (v7x megacore), 32-row aligned, capped at ~4 MiB.
        tile_rows = min(max_rows, _round_up(pl.cdiv(rows, 2), _ROW_ALIGN))

    grid = (pl.cdiv(rows, tile_rows),)

    kwargs = {}
    if in_place:
        kwargs["input_output_aliases"] = {0: 0}

    return pl.pallas_call(
        _active_ben_kernel,
        out_shape=jax.ShapeDtypeStruct((rows, lane), x2d.dtype),
        grid_spec=pltpu.PrefetchScalarGridSpec(
            num_scalar_prefetch=0,
            grid=grid,
            in_specs=[pl.BlockSpec((tile_rows, lane), lambda i: (i, 0))],
            out_specs=pl.BlockSpec((tile_rows, lane), lambda i: (i, 0)),
        ),
        compiler_params=pltpu.CompilerParams(
            dimension_semantics=("parallel",),    # megacore sharding on v7x
            vmem_limit_bytes=32 * 1024 * 1024,    # >= v5e default; <= v7x physical
        ),
        **kwargs,
    )(x2d)


def _active_ben_ref(x):
    """Pure-JAX reference matching the PyTorch module (independent formula)."""
    third = 1.0 / 3.0
    mid = x * (x * x + 3.0) / 6.0
    return jnp.where(x <= -1.0, x + third,
                     jnp.where(x >= 1.0, x - third, mid))


@partial(jax.jit, static_argnames=("in_place",))
def active_ben(x, *, in_place=False):
    """Elementwise ActiveBen activation on an arbitrarily-shaped array."""
    orig_shape = x.shape
    total = x.size
    if total == 0:
        return x

    flat = x.reshape(-1)                      # free for a contiguous array
    lane = _pick_lane(total)
    if lane is not None:
        # Aligned: pure reshape in/out, zero extra HBM passes.
        out2d = _run_2d(flat.reshape(total // lane, lane), in_place=in_place)
        return out2d.reshape(orig_shape)

    # Unaligned: kernel on the 128-aligned head, tiny (<128 elem) tail in
    # plain JAX, single concat — instead of whole-array pad + slice.
    head_len = (total // 128) * 128
    if head_len == 0:
        return _active_ben_ref(flat).reshape(orig_shape)
    lane = _pick_lane(head_len)
    head = _run_2d(flat[:head_len].reshape(head_len // lane, lane),
                   in_place=in_place)
    tail = _active_ben_ref(flat[head_len:])
    return jnp.concatenate([head.reshape(-1), tail]).reshape(orig_shape)


if __name__ == "__main__":
    key = jax.random.PRNGKey(0)
    # Small deterministic example: batch=2, channels=4, spatial=16x16.
    x = 3.0 * jax.random.normal(key, (2, 4, 16, 16), dtype=jnp.float32)

    out = active_ben(x)
    jax.block_until_ready(out)
    ref = _active_ben_ref(x)
    assert out.shape == x.shape and out.dtype == x.dtype
    assert jnp.allclose(out, ref, atol=1e-5, rtol=1e-5)

    # Exercise the multi-tile grid and the unaligned-tail path.
    x2 = 2.5 * jax.random.normal(jax.random.PRNGKey(1), (3, 7, 31, 33),
                                 dtype=jnp.float32)
    out2 = active_ben(x2)
    jax.block_until_ready(out2)
    assert jnp.allclose(out2, _active_ben_ref(x2), atol=1e-5, rtol=1e-5)

    # Exercise the aliased (in-place capable) variant.
    out3 = active_ben(x, in_place=True)
    jax.block_until_ready(out3)
    assert jnp.allclose(out3, ref, atol=1e-5, rtol=1e-5)

    print("KERNEL_OK")
</pallas_src>

<mosaic_0001>
module attributes {stable_mosaic.version = 11 : i64} {
  func.func @_active_ben_kernel(%arg0: i32, %arg1: memref<4x512xf32, #tpu.memory_space<vmem>>, %arg2: memref<4x512xf32, #tpu.memory_space<vmem>>) attributes {dimension_semantics = [#tpu.dimension_semantics<parallel>], iteration_bounds = array<i64: 1>, scalar_prefetch = 0 : i64, scratch_operands = 0 : i64, tpu.core_type = #tpu.core_type<tc>, window_params = [{transform_indices = @transform_0, window_bounds = array<i64: 4, 512>}, {transform_indices = @transform_1, window_bounds = array<i64: 4, 512>}]} {
    %c0 = arith.constant 0 : index
    %c0_0 = arith.constant 0 : index
    %0 = vector.load %arg1[%c0, %c0_0] : memref<4x512xf32, #tpu.memory_space<vmem>>, vector<4x512xf32>
    %cst = arith.constant -1.000000e+00 : f32
    %cst_1 = arith.constant 1.000000e+00 : f32
    %1 = vector.broadcast %cst : f32 to vector<4x512xf32>
    %2 = arith.maximumf %1, %0 : vector<4x512xf32>
    %3 = vector.broadcast %cst_1 : f32 to vector<4x512xf32>
    %4 = arith.minimumf %3, %2 : vector<4x512xf32>
    %5 = arith.subf %0, %4 : vector<4x512xf32>
    %6 = arith.mulf %4, %4 : vector<4x512xf32>
    %cst_2 = arith.constant 3.000000e+00 : f32
    %7 = vector.broadcast %cst_2 : f32 to vector<4x512xf32>
    %8 = arith.addf %6, %7 : vector<4x512xf32>
    %9 = arith.mulf %4, %8 : vector<4x512xf32>
    %cst_3 = arith.constant 0.166666672 : f32
    %10 = vector.broadcast %cst_3 : f32 to vector<4x512xf32>
    %11 = arith.mulf %9, %10 : vector<4x512xf32>
    %12 = arith.addf %5, %11 : vector<4x512xf32>
    %c0_4 = arith.constant 0 : index
    %c0_5 = arith.constant 0 : index
    %13 = vector.load %arg2[%c0_4, %c0_5] : memref<4x512xf32, #tpu.memory_space<vmem>>, vector<4x512xf32>
    tpu.vector_store %arg2[%c0_4, %c0_5], %12 {strides = array<i32>} : memref<4x512xf32, #tpu.memory_space<vmem>>, vector<4x512xf32>,
    return
  }
  func.func @transform_0(%arg0: i32) -> (i32, i32) {
    %c0_i32 = arith.constant 0 : i32
    %c0_i32_0 = arith.constant 0 : i32
    return %arg0, %c0_i32 : i32, i32
  }
  func.func @transform_1(%arg0: i32) -> (i32, i32) {
    %c0_i32 = arith.constant 0 : i32
    %c0_i32_0 = arith.constant 0 : i32
    return %arg0, %c0_i32 : i32, i32
  }
}

</mosaic_0001>

<bundles_post_ra>
// kernel: active_ben.1
= control target key start
LH: loop header
LB: loop body
LE: loop exit
PB: predicated region body
PF: predicated region fallthrough
CT: control target
= control target key end

     0   :  { %s56_s0 = inlined_call_operand.vmem [shape: f32[4,512], index: 0, kind: input, shape index: {}]   ;;  %s57_s1 = inlined_call_operand.vmem [shape: f32[4,512], index: 1, kind: output, shape index: {}]  }
   0x1   :  { %v8_v0 = vld [vmem:[%s56_s0] sm:$0xff]  ;;  %v9_v1 = vld [vmem:[%s56_s0 + $0x8] sm:$0xff] }
   0x2   :  { %v32_v2 = vclamps-f32 %v8_v0, 1.0  ;;  %v33_v3 = vclamps-f32 %v9_v1, 1.0 }
   0x4   :  { %v16_v4 = vmul.f32 %v32_v2, %v32_v2  ;;  %v17_v5 = vmul.f32 %v33_v3, %v33_v3  ;;  %v14_v8 = vsub.f32 %v8_v0, %v32_v2  ;;  %v15_v10 = vsub.f32 %v9_v1, %v33_v3 }
   0x6   :  { %v18_v6 = vadd.f32 3.0, %v16_v4  ;;  %v19_v7 = vadd.f32 3.0, %v17_v5 }
   0x8   :  { %v20_v9 = vmul.f32 %v32_v2, %v18_v6  ;;  %v21_v11 = vmul.f32 %v33_v3, %v19_v7 }
   0xa   :  { %v22_v12 = vmul.f32 0.16666667, %v20_v9  ;;  %v23_v13 = vmul.f32 0.16666667, %v21_v11 }
   0xc   :  { %v24_v14 = vadd.f32 %v22_v12, %v14_v8  ;;  %v25_v15 = vadd.f32 %v23_v13, %v15_v10 }
   0xe   :  { %26 = vst [vmem:[%s57_s1] sm:$0xff] %v24_v14  ;;  %27 = vst [vmem:[%s57_s1 + $0x8] sm:$0xff] %v25_v15 }

</bundles_post_ra>
